<compile_context>
chip_gen: v5e
topology: v5e:2x2
jax: 0.10.0
libtpu: 0.0.40
codegen_flags: <defaults>
</compile_context>

<pallas_src>
import functools

import jax
import jax.numpy as jnp
from jax.experimental import pallas as pl
from jax.experimental.pallas import tpu as pltpu

SMOOTH = 1.0
IGNORE_INDEX = 255
WEIGHT = 0.5          # deterministic "weight" passed to CE_Dice_Loss.__init__
MAX_TILE = 8192       # lanes per spatial tile (multiple of 128)


def _round_up(x, m):
    return ((x + m - 1) // m) * m


def _ce_dice_kernel(x_ref, t_ref,
                    ce_ref, cnt_ref, inter_ref, psum_ref, tsum_ref,
                    *, num_classes, hw, tile):
    b = pl.program_id(1)

    # Zero the resident per-sample accumulators at the start of each sample's
    # spatial sweep (output blocks are indexed by the batch axis only).
    @pl.when(b == 0)
    def _():
        ce_ref[...] = jnp.zeros_like(ce_ref)
        cnt_ref[...] = jnp.zeros_like(cnt_ref)
        inter_ref[...] = jnp.zeros_like(inter_ref)
        psum_ref[...] = jnp.zeros_like(psum_ref)
        tsum_ref[...] = jnp.zeros_like(tsum_ref)

    x = x_ref[0].astype(jnp.float32)   # (C, TILE) logits
    t = t_ref[0]                       # (1, TILE) int32 labels

    # Numerically-stable softmax pieces; never materialize full p / logp.
    m = jnp.max(x, axis=0, keepdims=True)            # (1, TILE)
    sh = x - m                                       # (C, TILE)
    ex = jnp.exp(sh)                                 # (C, TILE)
    denom = jnp.sum(ex, axis=0, keepdims=True)       # (1, TILE)

    # EUP approximate reciprocal + one Newton step -> ~f32-exact 1/denom.
    inv = pl.reciprocal(denom, approx=True)
    inv = inv * (2.0 - denom * inv)
    logd = jnp.log(denom)                            # (1, TILE)

    valid = t != IGNORE_INDEX
    t_safe = jnp.where(valid, t, 0)

    # Fused one-hot gather of the target's shifted logit (no logp tensor).
    cid = jax.lax.broadcasted_iota(jnp.int32, (num_classes, tile), 0)
    gathered = jnp.sum(jnp.where(cid == t_safe, sh, 0.0),
                       axis=0, keepdims=True)        # (1, TILE)

    validf = valid.astype(jnp.float32)               # (1, TILE)
    p1 = ex[1:2, :] * inv                            # softmax channel 1
    tf = t.astype(jnp.float32)                       # raw labels (matches
                                                     # Dice_Loss: no ignore mask)

    # Mask out padded pixels (only generated if HW is not a multiple of TILE).
    if hw % tile != 0:
        col = jax.lax.broadcasted_iota(jnp.int32, (1, tile), 1)
        inb = ((b * tile + col) < hw).astype(jnp.float32)
        validf = validf * inb
        p1 = p1 * inb
        tf = tf * inb

    # Element-wise partial-sum accumulation (cross-lane reduce deferred to the
    # JAX wrapper -> no per-step XLU reductions, no SMEM scalar RMW chain).
    ce_ref[0] = ce_ref[0] + (logd - gathered) * validf   # sum of -log p_target
    cnt_ref[0] = cnt_ref[0] + validf                     # valid pixel count
    inter_ref[0] = inter_ref[0] + p1 * tf                # dice intersection
    psum_ref[0] = psum_ref[0] + p1                       # dice pred sum
    tsum_ref[0] = tsum_ref[0] + tf                       # dice target sum


def ce_dice_loss(inputs, targets, weight=WEIGHT, max_tile=MAX_TILE):
    """inputs: (N, C, H, W) float logits; targets: (N, H, W) int labels."""
    N, C, H, W = inputs.shape
    assert C >= 2, "Dice_Loss hard-codes channel 1 as the object channel"
    HW = H * W

    # Lane-dense flattened layout.
    x = inputs.reshape(N, C, HW).astype(jnp.float32)
    t = targets.reshape(N, 1, HW).astype(jnp.int32)

    tile = min(max_tile, _round_up(HW, 128))
    hw_pad = _round_up(HW, tile)
    if hw_pad != HW:
        x = jnp.pad(x, ((0, 0), (0, 0), (0, hw_pad - HW)))
        t = jnp.pad(t, ((0, 0), (0, 0), (0, hw_pad - HW)),
                    constant_values=IGNORE_INDEX)
    nb = hw_pad // tile

    kernel = functools.partial(
        _ce_dice_kernel, num_classes=C, hw=HW, tile=tile)

    part_shape = jax.ShapeDtypeStruct((N, 1, tile), jnp.float32)
    part_spec = pl.BlockSpec((1, 1, tile), lambda n, b: (n, 0, 0))

    ce_p, cnt_p, inter_p, psum_p, tsum_p = pl.pallas_call(
        kernel,
        out_shape=(part_shape,) * 5,
        grid_spec=pltpu.PrefetchScalarGridSpec(
            num_scalar_prefetch=0,
            grid=(N, nb),
            in_specs=[
                pl.BlockSpec((1, C, tile), lambda n, b: (n, 0, b)),
                pl.BlockSpec((1, 1, tile), lambda n, b: (n, 0, b)),
            ],
            out_specs=(part_spec,) * 5,
        ),
        compiler_params=pltpu.CompilerParams(
            dimension_semantics=("parallel", "arbitrary")),
    )(x, t)

    # Tiny final reduction + scalar combine (O(N*TILE)) in plain JAX.
    ce_n = jnp.sum(ce_p, axis=(1, 2))
    cnt_n = jnp.sum(cnt_p, axis=(1, 2))
    inter_n = jnp.sum(inter_p, axis=(1, 2))
    psum_n = jnp.sum(psum_p, axis=(1, 2))
    tsum_n = jnp.sum(tsum_p, axis=(1, 2))

    # max(count, 1) only changes the degenerate all-ignored case (would be NaN).
    ce = jnp.sum(ce_n) / jnp.maximum(jnp.sum(cnt_n), 1.0)
    dice = 1.0 - (2.0 * inter_n + SMOOTH) / (psum_n + tsum_n + SMOOTH)
    return weight * ce + jnp.mean(dice)


def ce_dice_ref(inputs, targets, weight=WEIGHT):
    """Pure-JAX reference mirroring the PyTorch module."""
    logp = jax.nn.log_softmax(inputs, axis=1)
    p = jax.nn.softmax(inputs, axis=1)
    valid = targets != IGNORE_INDEX
    t_safe = jnp.where(valid, targets, 0)
    nll = -jnp.take_along_axis(logp, t_safe[:, None], axis=1)[:, 0]
    validf = valid.astype(jnp.float32)
    ce = jnp.sum(nll * validf) / jnp.maximum(jnp.sum(validf), 1.0)
    p1 = p[:, 1]
    tf = targets.astype(jnp.float32)
    inter = jnp.sum(p1 * tf, axis=(1, 2))
    dice = 1.0 - (2.0 * inter + SMOOTH) / (
        jnp.sum(p1, axis=(1, 2)) + jnp.sum(tf, axis=(1, 2)) + SMOOTH)
    return weight * ce + jnp.mean(dice)


if __name__ == "__main__":
    key = jax.random.PRNGKey(0)
    k1, k2 = jax.random.split(key)
    N, C, H, W = 2, 4, 16, 16
    inputs = jax.random.normal(k1, (N, C, H, W), dtype=jnp.float32)
    targets = jax.random.randint(k2, (N, H, W), 0, C, dtype=jnp.int32)
    # Exercise the CE ignore_index path (dice uses raw labels, as in the spec).
    targets = targets.at[0, 0, :3].set(IGNORE_INDEX)

    loss = ce_dice_loss(inputs, targets)
    jax.block_until_ready(loss)

    ref = ce_dice_ref(inputs, targets)
    assert abs(float(loss) - float(ref)) < 5e-4, (float(loss), float(ref))
    print("KERNEL_OK")
</pallas_src>

<mosaic_0001>
module attributes {stable_mosaic.version = 11 : i64} {
  func.func @_ce_dice_kernel(%arg0: i32, %arg1: i32, %arg2: memref<1x4x256xf32, #tpu.memory_space<vmem>>, %arg3: memref<1x1x256xi32, #tpu.memory_space<vmem>>, %arg4: memref<1x1x256xf32, #tpu.memory_space<vmem>>, %arg5: memref<1x1x256xf32, #tpu.memory_space<vmem>>, %arg6: memref<1x1x256xf32, #tpu.memory_space<vmem>>, %arg7: memref<1x1x256xf32, #tpu.memory_space<vmem>>, %arg8: memref<1x1x256xf32, #tpu.memory_space<vmem>>) attributes {dimension_semantics = [#tpu.dimension_semantics<parallel>, #tpu.dimension_semantics<arbitrary>], iteration_bounds = array<i64: 2, 1>, scalar_prefetch = 0 : i64, scratch_operands = 0 : i64, tpu.core_type = #tpu.core_type<tc>, window_params = [{transform_indices = @transform_0, window_bounds = array<i64: 1, 4, 256>}, {transform_indices = @transform_1, window_bounds = array<i64: 1, 1, 256>}, {transform_indices = @transform_2, window_bounds = array<i64: 1, 1, 256>}, {transform_indices = @transform_3, window_bounds = array<i64: 1, 1, 256>}, {transform_indices = @transform_4, window_bounds = array<i64: 1, 1, 256>}, {transform_indices = @transform_5, window_bounds = array<i64: 1, 1, 256>}, {transform_indices = @transform_6, window_bounds = array<i64: 1, 1, 256>}]} {
    %c0_i32 = arith.constant 0 : i32
    %0 = arith.cmpi eq, %arg1, %c0_i32 : i32
    %1 = arith.extui %0 : i1 to i32
    %c0_i32_0 = arith.constant 0 : i32
    %2 = arith.cmpi ne, %1, %c0_i32_0 : i32
    scf.if %2 {
      %cst_41 = arith.constant 0.000000e+00 : f32
      %69 = vector.broadcast %cst_41 : f32 to vector<1x1x256xf32>
      %c0_42 = arith.constant 0 : index
      %c0_43 = arith.constant 0 : index
      %c0_44 = arith.constant 0 : index
      %70 = vector.load %arg4[%c0_42, %c0_43, %c0_44] : memref<1x1x256xf32, #tpu.memory_space<vmem>>, vector<1x1x256xf32>
      tpu.vector_store %arg4[%c0_42, %c0_43, %c0_44], %69 {strides = array<i32>} : memref<1x1x256xf32, #tpu.memory_space<vmem>>, vector<1x1x256xf32>,
      %cst_45 = arith.constant 0.000000e+00 : f32
      %71 = vector.broadcast %cst_45 : f32 to vector<1x1x256xf32>
      %c0_46 = arith.constant 0 : index
      %c0_47 = arith.constant 0 : index
      %c0_48 = arith.constant 0 : index
      %72 = vector.load %arg5[%c0_46, %c0_47, %c0_48] : memref<1x1x256xf32, #tpu.memory_space<vmem>>, vector<1x1x256xf32>
      tpu.vector_store %arg5[%c0_46, %c0_47, %c0_48], %71 {strides = array<i32>} : memref<1x1x256xf32, #tpu.memory_space<vmem>>, vector<1x1x256xf32>,
      %cst_49 = arith.constant 0.000000e+00 : f32
      %73 = vector.broadcast %cst_49 : f32 to vector<1x1x256xf32>
      %c0_50 = arith.constant 0 : index
      %c0_51 = arith.constant 0 : index
      %c0_52 = arith.constant 0 : index
      %74 = vector.load %arg6[%c0_50, %c0_51, %c0_52] : memref<1x1x256xf32, #tpu.memory_space<vmem>>, vector<1x1x256xf32>
      tpu.vector_store %arg6[%c0_50, %c0_51, %c0_52], %73 {strides = array<i32>} : memref<1x1x256xf32, #tpu.memory_space<vmem>>, vector<1x1x256xf32>,
      %cst_53 = arith.constant 0.000000e+00 : f32
      %75 = vector.broadcast %cst_53 : f32 to vector<1x1x256xf32>
      %c0_54 = arith.constant 0 : index
      %c0_55 = arith.constant 0 : index
      %c0_56 = arith.constant 0 : index
      %76 = vector.load %arg7[%c0_54, %c0_55, %c0_56] : memref<1x1x256xf32, #tpu.memory_space<vmem>>, vector<1x1x256xf32>
      tpu.vector_store %arg7[%c0_54, %c0_55, %c0_56], %75 {strides = array<i32>} : memref<1x1x256xf32, #tpu.memory_space<vmem>>, vector<1x1x256xf32>,
      %cst_57 = arith.constant 0.000000e+00 : f32
      %77 = vector.broadcast %cst_57 : f32 to vector<1x1x256xf32>
      %c0_58 = arith.constant 0 : index
      %c0_59 = arith.constant 0 : index
      %c0_60 = arith.constant 0 : index
      %78 = vector.load %arg8[%c0_58, %c0_59, %c0_60] : memref<1x1x256xf32, #tpu.memory_space<vmem>>, vector<1x1x256xf32>
      tpu.vector_store %arg8[%c0_58, %c0_59, %c0_60], %77 {strides = array<i32>} : memref<1x1x256xf32, #tpu.memory_space<vmem>>, vector<1x1x256xf32>,
    } else {
    }
    %c0 = arith.constant 0 : index
    %c0_1 = arith.constant 0 : index
    %c0_2 = arith.constant 0 : index
    %3 = vector.load %arg2[%c0, %c0_1, %c0_2] : memref<1x4x256xf32, #tpu.memory_space<vmem>>, vector<1x4x256xf32>
    %4 = vector.shape_cast %3 : vector<1x4x256xf32> to vector<4x256xf32>
    %c0_3 = arith.constant 0 : index
    %c0_4 = arith.constant 0 : index
    %c0_5 = arith.constant 0 : index
    %5 = vector.load %arg3[%c0_3, %c0_4, %c0_5] : memref<1x1x256xi32, #tpu.memory_space<vmem>>, vector<1x1x256xi32>
    %6 = vector.shape_cast %5 : vector<1x1x256xi32> to vector<1x256xi32>
    %cst = arith.constant dense<0xFF800000> : vector<256xf32>
    %7 = vector.multi_reduction <maximumf>, %4, %cst [0] : vector<4x256xf32> to vector<256xf32>
    %8 = vector.shape_cast %7 : vector<256xf32> to vector<1x256xf32>
    %9 = vector.broadcast %8 : vector<1x256xf32> to vector<4x256xf32>
    %10 = arith.subf %4, %9 : vector<4x256xf32>
    %11 = math.exp %10 : vector<4x256xf32>
    %cst_6 = arith.constant dense<0.000000e+00> : vector<256xf32>
    %12 = vector.multi_reduction <add>, %11, %cst_6 [0] : vector<4x256xf32> to vector<256xf32>
    %13 = vector.shape_cast %12 : vector<256xf32> to vector<1x256xf32>
    %14 = tpu.reciprocal %13 {approx = true} : vector<1x256xf32> -> vector<1x256xf32>
    %15 = arith.mulf %13, %14 : vector<1x256xf32>
    %cst_7 = arith.constant 2.000000e+00 : f32
    %16 = vector.broadcast %cst_7 : f32 to vector<1x256xf32>
    %17 = arith.subf %16, %15 : vector<1x256xf32>
    %18 = arith.mulf %14, %17 : vector<1x256xf32>
    %19 = math.log %13 : vector<1x256xf32>
    %c255_i32 = arith.constant 255 : i32
    %20 = vector.broadcast %c255_i32 : i32 to vector<1x256xi32>
    %21 = arith.cmpi ne, %6, %20 : vector<1x256xi32>
    %c0_i32_8 = arith.constant 0 : i32
    %22 = vector.broadcast %c0_i32_8 : i32 to vector<1x256xi32>
    %23 = arith.select %21, %6, %22 : vector<1x256xi1>, vector<1x256xi32>
    %24 = tpu.iota {dimensions = array<i32: 0>} : vector<4x256xi32>
    %25 = vector.broadcast %23 : vector<1x256xi32> to vector<4x256xi32>
    %26 = arith.cmpi eq, %24, %25 : vector<4x256xi32>
    %cst_9 = arith.constant 0.000000e+00 : f32
    %27 = vector.broadcast %cst_9 : f32 to vector<4x256xf32>
    %28 = arith.select %26, %10, %27 : vector<4x256xi1>, vector<4x256xf32>
    %cst_10 = arith.constant dense<0.000000e+00> : vector<256xf32>
    %29 = vector.multi_reduction <add>, %28, %cst_10 [0] : vector<4x256xf32> to vector<256xf32>
    %30 = vector.shape_cast %29 : vector<256xf32> to vector<1x256xf32>
    %31 = arith.extui %21 : vector<1x256xi1> to vector<1x256xi32>
    %32 = arith.sitofp %31 : vector<1x256xi32> to vector<1x256xf32>
    %33 = vector.extract_strided_slice %11 {offsets = [1, 0], sizes = [1, 256], strides = [1, 1]} : vector<4x256xf32> to vector<1x256xf32>
    %34 = arith.mulf %33, %18 : vector<1x256xf32>
    %35 = arith.sitofp %6 : vector<1x256xi32> to vector<1x256xf32>
    %c0_11 = arith.constant 0 : index
    %c0_12 = arith.constant 0 : index
    %c0_13 = arith.constant 0 : index
    %36 = vector.load %arg4[%c0_11, %c0_12, %c0_13] : memref<1x1x256xf32, #tpu.memory_space<vmem>>, vector<1x1x256xf32>
    %37 = vector.shape_cast %36 : vector<1x1x256xf32> to vector<1x256xf32>
    %38 = arith.subf %19, %30 : vector<1x256xf32>
    %39 = arith.mulf %38, %32 : vector<1x256xf32>
    %40 = arith.addf %37, %39 : vector<1x256xf32>
    %c0_14 = arith.constant 0 : index
    %c0_15 = arith.constant 0 : index
    %c0_16 = arith.constant 0 : index
    %41 = vector.load %arg4[%c0_14, %c0_15, %c0_16] : memref<1x1x256xf32, #tpu.memory_space<vmem>>, vector<1x1x256xf32>
    %42 = vector.shape_cast %41 : vector<1x1x256xf32> to vector<1x256xf32>
    %43 = vector.shape_cast %40 : vector<1x256xf32> to vector<1x1x256xf32>
    tpu.vector_store %arg4[%c0_14, %c0_15, %c0_16], %43 {strides = array<i32>} : memref<1x1x256xf32, #tpu.memory_space<vmem>>, vector<1x1x256xf32>,
    %c0_17 = arith.constant 0 : index
    %c0_18 = arith.constant 0 : index
    %c0_19 = arith.constant 0 : index
    %44 = vector.load %arg5[%c0_17, %c0_18, %c0_19] : memref<1x1x256xf32, #tpu.memory_space<vmem>>, vector<1x1x256xf32>
    %45 = vector.shape_cast %44 : vector<1x1x256xf32> to vector<1x256xf32>
    %46 = arith.addf %45, %32 : vector<1x256xf32>
    %c0_20 = arith.constant 0 : index
    %c0_21 = arith.constant 0 : index
    %c0_22 = arith.constant 0 : index
    %47 = vector.load %arg5[%c0_20, %c0_21, %c0_22] : memref<1x1x256xf32, #tpu.memory_space<vmem>>, vector<1x1x256xf32>
    %48 = vector.shape_cast %47 : vector<1x1x256xf32> to vector<1x256xf32>
    %49 = vector.shape_cast %46 : vector<1x256xf32> to vector<1x1x256xf32>
    tpu.vector_store %arg5[%c0_20, %c0_21, %c0_22], %49 {strides = array<i32>} : memref<1x1x256xf32, #tpu.memory_space<vmem>>, vector<1x1x256xf32>,
    %c0_23 = arith.constant 0 : index
    %c0_24 = arith.constant 0 : index
    %c0_25 = arith.constant 0 : index
    %50 = vector.load %arg6[%c0_23, %c0_24, %c0_25] : memref<1x1x256xf32, #tpu.memory_space<vmem>>, vector<1x1x256xf32>
    %51 = vector.shape_cast %50 : vector<1x1x256xf32> to vector<1x256xf32>
    %52 = arith.mulf %34, %35 : vector<1x256xf32>
    %53 = arith.addf %51, %52 : vector<1x256xf32>
    %c0_26 = arith.constant 0 : index
    %c0_27 = arith.constant 0 : index
    %c0_28 = arith.constant 0 : index
    %54 = vector.load %arg6[%c0_26, %c0_27, %c0_28] : memref<1x1x256xf32, #tpu.memory_space<vmem>>, vector<1x1x256xf32>
    %55 = vector.shape_cast %54 : vector<1x1x256xf32> to vector<1x256xf32>
    %56 = vector.shape_cast %53 : vector<1x256xf32> to vector<1x1x256xf32>
    tpu.vector_store %arg6[%c0_26, %c0_27, %c0_28], %56 {strides = array<i32>} : memref<1x1x256xf32, #tpu.memory_space<vmem>>, vector<1x1x256xf32>,
    %c0_29 = arith.constant 0 : index
    %c0_30 = arith.constant 0 : index
    %c0_31 = arith.constant 0 : index
    %57 = vector.load %arg7[%c0_29, %c0_30, %c0_31] : memref<1x1x256xf32, #tpu.memory_space<vmem>>, vector<1x1x256xf32>
    %58 = vector.shape_cast %57 : vector<1x1x256xf32> to vector<1x256xf32>
    %59 = arith.addf %58, %34 : vector<1x256xf32>
    %c0_32 = arith.constant 0 : index
    %c0_33 = arith.constant 0 : index
    %c0_34 = arith.constant 0 : index
    %60 = vector.load %arg7[%c0_32, %c0_33, %c0_34] : memref<1x1x256xf32, #tpu.memory_space<vmem>>, vector<1x1x256xf32>
    %61 = vector.shape_cast %60 : vector<1x1x256xf32> to vector<1x256xf32>
    %62 = vector.shape_cast %59 : vector<1x256xf32> to vector<1x1x256xf32>
    tpu.vector_store %arg7[%c0_32, %c0_33, %c0_34], %62 {strides = array<i32>} : memref<1x1x256xf32, #tpu.memory_space<vmem>>, vector<1x1x256xf32>,
    %c0_35 = arith.constant 0 : index
    %c0_36 = arith.constant 0 : index
    %c0_37 = arith.constant 0 : index
    %63 = vector.load %arg8[%c0_35, %c0_36, %c0_37] : memref<1x1x256xf32, #tpu.memory_space<vmem>>, vector<1x1x256xf32>
    %64 = vector.shape_cast %63 : vector<1x1x256xf32> to vector<1x256xf32>
    %65 = arith.addf %64, %35 : vector<1x256xf32>
    %c0_38 = arith.constant 0 : index
    %c0_39 = arith.constant 0 : index
    %c0_40 = arith.constant 0 : index
    %66 = vector.load %arg8[%c0_38, %c0_39, %c0_40] : memref<1x1x256xf32, #tpu.memory_space<vmem>>, vector<1x1x256xf32>
    %67 = vector.shape_cast %66 : vector<1x1x256xf32> to vector<1x256xf32>
    %68 = vector.shape_cast %65 : vector<1x256xf32> to vector<1x1x256xf32>
    tpu.vector_store %arg8[%c0_38, %c0_39, %c0_40], %68 {strides = array<i32>} : memref<1x1x256xf32, #tpu.memory_space<vmem>>, vector<1x1x256xf32>,
    return
  }
  func.func @transform_0(%arg0: i32, %arg1: i32) -> (i32, i32, i32) {
    %c0_i32 = arith.constant 0 : i32
    %c0_i32_0 = arith.constant 0 : i32
    return %arg0, %c0_i32, %arg1 : i32, i32, i32
  }
  func.func @transform_1(%arg0: i32, %arg1: i32) -> (i32, i32, i32) {
    %c0_i32 = arith.constant 0 : i32
    %c0_i32_0 = arith.constant 0 : i32
    return %arg0, %c0_i32, %arg1 : i32, i32, i32
  }
  func.func @transform_2(%arg0: i32, %arg1: i32) -> (i32, i32, i32) {
    %c0_i32 = arith.constant 0 : i32
    %c0_i32_0 = arith.constant 0 : i32
    %c0_i32_1 = arith.constant 0 : i32
    return %arg0, %c0_i32, %c0_i32_0 : i32, i32, i32
  }
  func.func @transform_3(%arg0: i32, %arg1: i32) -> (i32, i32, i32) {
    %c0_i32 = arith.constant 0 : i32
    %c0_i32_0 = arith.constant 0 : i32
    %c0_i32_1 = arith.constant 0 : i32
    return %arg0, %c0_i32, %c0_i32_0 : i32, i32, i32
  }
  func.func @transform_4(%arg0: i32, %arg1: i32) -> (i32, i32, i32) {
    %c0_i32 = arith.constant 0 : i32
    %c0_i32_0 = arith.constant 0 : i32
    %c0_i32_1 = arith.constant 0 : i32
    return %arg0, %c0_i32, %c0_i32_0 : i32, i32, i32
  }
  func.func @transform_5(%arg0: i32, %arg1: i32) -> (i32, i32, i32) {
    %c0_i32 = arith.constant 0 : i32
    %c0_i32_0 = arith.constant 0 : i32
    %c0_i32_1 = arith.constant 0 : i32
    return %arg0, %c0_i32, %c0_i32_0 : i32, i32, i32
  }
  func.func @transform_6(%arg0: i32, %arg1: i32) -> (i32, i32, i32) {
    %c0_i32 = arith.constant 0 : i32
    %c0_i32_0 = arith.constant 0 : i32
    %c0_i32_1 = arith.constant 0 : i32
    return %arg0, %c0_i32, %c0_i32_0 : i32, i32, i32
  }
}

</mosaic_0001>

<bundles_post_ra>
// kernel: tpu_custom_call.1
= control target key start
LH: loop header
LB: loop body
LE: loop exit
PB: predicated region body
PF: predicated region fallthrough
CT: control target
= control target key end

     0   :  { %s1615_s0 = inlined_call_operand.hbm [shape: f32[2,4,256], index: 0, kind: input, shape index: {}]   ;;  %s1616_s1 = inlined_call_operand.hbm [shape: s32[2,1,256], index: 1, kind: input, shape index: {}]   ;;  %s1617_s2 = inlined_call_operand.hbm [shape: f32[2,1,256], index: 2, kind: output, shape index: {0}]   ;;  %s1618_s3 = inlined_call_operand.hbm [shape: f32[2,1,256], index: 3, kind: output, shape index: {1}]   ;;  %s1619_s4 = inlined_call_operand.hbm [shape: f32[2,1,256], index: 4, kind: output, shape index: {2}]   ;;  %s1620_s5 = inlined_call_operand.hbm [shape: f32[2,1,256], index: 5, kind: output, shape index: {3}]   ;;  %s1621_s6 = inlined_call_operand.hbm [shape: f32[2,1,256], index: 6, kind: output, shape index: {4}]  }
   0x1   :  { %1625 = sst [smem:[#allocation21_spill]] %s1615_s0 }
   0x2   :  { %1626 = sst [smem:[#allocation22_spill]] %s1616_s1 }
   0x3   :  { %1627 = sst [smem:[#allocation23_spill]] %s1617_s2 }
   0x4   :  { %12 = vsyncpa [#allocation3], 0 }
   0x5   :  { %14 = vsyncpa [#allocation3 + $0x1], 0 }
   0x6   :  { %15 = vsyncpa [#allocation6], 0 }
   0x7   :  { %17 = vsyncpa [#allocation6 + $0x1], 0 }
   0x8   :  { %18 = vsyncpa [#allocation4], 0 }
   0x9   :  { %20 = vsyncpa [#allocation4 + $0x1], 0 }
   0xa   :  { %21 = vsyncpa [#allocation9], 0 }
   0xb   :  { %23 = vsyncpa [#allocation9 + $0x1], 0 }
   0xc   :  { %24 = vsyncpa [#allocation12], 0 }
   0xd   :  { %26 = vsyncpa [#allocation12 + $0x1], 0  ;;  %s1292_s21 = smov 0   ;;  %s1294_s22 = smov 0  }
   0xe   :  { %s1296_s23 = smov 0   ;;  %s1298_s24 = smov 0  }
   0xf   :  { %s1300_s25 = smov 0   ;;  %s1302_s26 = smov 0  }
  0x10 LB: > { %s1323_s27 = sadd.s32 4294967295, %s1253_s26   ;;  %s1622_s28 = sadd.s32 4294967294, %s1253_s26   ;;  %s1253_s26 = sphi %s1302_s26, %s32_s26   ;;  %s1249_s25 = sphi %s1300_s25, %s1650_s25   ;;  %s1245_s24 = sphi %s1298_s24, %s1649_s24   ;;  %s1241_s23 = sphi %s1296_s23, %s1648_s23   ;;  %s1237_s22 = sphi %s1294_s22, %s1647_s22   ;;  %s1233_s21 = sphi %s1292_s21, %s1646_s21  }
  0x11   : > { %s44_s29 = sadd.s32 1, %s1249_s25  ;;  %s53_s30 = sadd.s32 1, %s1241_s23 }
  0x12   : > { %p46_p0 = scmp.ge.s32.totalorder %s44_s29, 2  ;;  %p60_p1 = scmp.ne.s32.totalorder %s1241_s23, %s1237_s22 }
  0x13   : > { %p61_p2 = scmp.eq.s32.totalorder %s1253_s26, 0  ;;  %p66_p3 = scmp.ne.s32.totalorder %s1237_s22, %s1233_s21 }
  0x14   : > { %s1652_s29 = smov (%p46_p0, %s44_s29), 0  ;;  %p67_p5 = scmp.eq.s32.totalorder %s1323_s27, 0 }
  0x15   : > { %1628 = sst [smem:[#allocation19_spill]] %s1652_s29  ;;  %p1335_p4 = por %p61_p2, %p60_p1 }
  0x16   : > { %s48_s8 = ssub.s32 %s1249_s25, %s1652_s29  ;;  %p118_p6 = scmp.eq.s32.totalorder %s1323_s27, 1 }
  0x17   : > { %p51_p7 = scmp.eq.s32.totalorder %s48_s8, 0  ;;  %p1343_p8 = por %p67_p5, %p66_p3 }
  0x18   : > { %p1347_p9 = por %p118_p6, %p60_p1  ;;  %p124_p10 = scmp.eq.s32.totalorder %s1622_s28, 1 }
  0x19   : > { %s1354_s11 = scalar_select %p51_p7, %s1241_s23, %s53_s30  }
  0x1a   : > { %p1356_p11 = por %p124_p10, %p66_p3  ;;  %p860_p12 = scmp.ge.s32.totalorder %s1253_s26, 2 }
  0x1b   : > { %1632 = sst [smem:[#allocation20_spill]] %s1354_s11  ;;  %p925_p13 = scmp.lt.s32.totalorder %s1253_s26, 2 }
  0x1c   : > { %s248_s13 = sand.u32 1, %s1241_s23   ;;  %s887_s15 = sshll.u32 %s1249_s25, 3 }
  0x1d   : > { %s861_s14 = sshll.u32 %s248_s13, 3  ;;  %s1634_s0 = sld [smem:[#allocation21_spill]] }
  0x1e   : > { %s252_s19 = scalar_lea.vmem [#allocation2], %s861_s14  ;;  %p1369_p0 = pnand %p925_p13, %p1335_p4 }
  0x1f   : > { %s263_s20 = sshll.u32 %s252_s19, 4  ;;  %p866_p1 = scmp.ge.s32.totalorder %s1253_s26, 1  ;;  %s264_s20 = int_to_ptr.vmem [resolvable:$true] %s263_s20 }
  0x20   : > { %p289_p2 = scmp.lt.s32.totalorder %s1253_s26, 3  ;;  %s249_s28 = scalar_lea.sflag [#allocation3], %s248_s13 }
  0x21   : > { %s864_s16 = sshll.u32 %s248_s13, 1  ;;  %s1636_s1 = sld [smem:[#allocation22_spill]] }
  0x22   : > { %p290_p3 = pnand %p866_p1, %p289_p2  ;;  %s274_s19 = scalar_lea.vmem [#allocation5], %s864_s16 }
  0x23   : > { %s259_s18 = scalar_lea.hbm %s1634_s0, %s887_s15  ;;  %s865_s15 = sshll.u32 %s1249_s25, 1 }
  0x24   : > { %s261_s8 = sshll.u32 %s259_s18, 4  ;;  %s284_s7 = sshll.u32 %s274_s19, 4  ;;  %s262_s8 = int_to_ptr.hbm [resolvable:$true] %s261_s8  ;;  %s285_s7 = int_to_ptr.vmem [resolvable:$true] %s284_s7 }
  0x25   : > { %905 = dma.hbm_to_vmem [thread:$0]  (!%p1369_p0), %s262_s8, 128, %s264_s20, %s249_s28  }
  0x26   : > { %s271_s29 = scalar_lea.sflag [#allocation6], %s248_s13  ;;  %293 = sbr.rel (%p290_p3) target bundleno = 168 (0xa8), region = 28 }
  0x27   : > { %s280_s18 = scalar_lea.hbm %s1636_s1, %s865_s15  ;;  %s1384_s11 = sand.u32 (!%p290_p3), 1, %s1237_s22  }
  0x28   : > { %s282_s0 = sshll.u32 %s280_s18, 4  ;;  %s867_s28 = sshll.u32 (!%p290_p3), %s1384_s11, 3  ;;  %s283_s0 = int_to_ptr.hbm [resolvable:$true] %s282_s0 }
  0x29   : > { %908 = dma.hbm_to_vmem [thread:$0]  (!%p1369_p0), %s283_s0, 32, %s285_s7, %s271_s29  }
  0x2a   : > { %s296_s20 = scalar_lea.sflag (!%p290_p3), [#allocation3], %s1384_s11  ;;  %s299_s8 = scalar_lea.vmem (!%p290_p3), [#allocation2], %s867_s28 }
  0x2b   : > { %1212 = dma.done.wait (%p1343_p8), %s296_s20, 128  }
  0x2c   : > { %1214 = vsyncadd (%p1343_p8), %s296_s20, 4294967168  ;;  %s1393_s13 = sshll.u32 %s1384_s11, 1  ;;  %s306_s0 = scalar_lea.sflag [#allocation6], %s1384_s11 }
  0x2d   : > { %s309_s29 = scalar_lea.vmem [#allocation5], %s1393_s13 }
  0x2e   : > { %1216 = dma.done.wait (%p1343_p8), %s306_s0, 32  }
  0x2f   : > { %1218 = vsyncadd (%p1343_p8), %s306_s0, 4294967264  ;;  %v379_v0 = vld [vmem:[%s299_s8] sm:$0xff]  ;;  %vm387_vm0 = vcmask 1043456   ;;  %v370_v21 = vlaneseq  ;;  %s1409_s9 = scalar_lea.vmem [#allocation7], %s1393_s13  ;;  %v1255_v23 = vmov 0.0   ;;  %s1421_s30 = scalar_lea.vmem [#allocation10], %s1393_s13 }
  0x30   : > { %382 = vst [vmem:[#allocation1] ss:$2 sm:$0xff] %v379_v0  ;;  %v1418_v25 = vld [vmem:[%s309_s29] sm:$0x3]  ;;  %s1428_s16 = scalar_lea.vmem [#allocation8], %s1393_s13  ;;  %s1435_s15 = scalar_lea.vmem [#allocation11], %s1393_s13 }
  0x31   : > { %vm1404_vm1 = vcmp.lt.s32.totalorder %v370_v21, 256  ;;  %vm442_vm2 = vcmp.ne.s32.totalorder %v1418_v25, 255  ;;  %s1441_s14 = scalar_lea.vmem [#allocation13], %s1393_s13  ;;  %s1450_s17 = sshll.u32 %s1245_s24, 1  ;;  %v445_v31 = vshrl.u32 %v370_v21, 7 }
  0x32   : > { %374 = vst.msk [vmem:[%s1409_s9] sm:$0x3] %vm1404_vm1, %v1255_v23  ;;  %v443_v26 = vsel %vm442_vm2, %v1418_v25, 0  ;;  %s578_s7 = scalar_lea.hbm %s1618_s3, %s1450_s17  ;;  %s1624_s24 = sand.u32 1, %s1323_s27   ;;  %v1468_v39 = vsel %vm442_vm2, 1.0, %v1255_v23 }
  0x33   : > { %376 = vst.msk [vmem:[%s1421_s30] sm:$0x3] %vm1404_vm1, %v1255_v23  ;;  %v446_v32 = vperm.slane %v443_v26, 0  ;;  %v447_v35 = vperm.slane %v443_v26, 1  ;;  %s580_s28 = sshll.u32 %s1428_s16, 4  ;;  %s1460_s20 = sshll.u32 %s578_s7, 4  ;;  %s581_s28 = int_to_ptr.vmem [resolvable:$true] %s580_s28  ;;  %s583_s20 = int_to_ptr.hbm [resolvable:$true] %s1460_s20 }
  0x34   : > { %375 = vst.msk [vmem:[%s1428_s16] sm:$0x3] %vm1404_vm1, %v1255_v23  ;;  %s1482_s8 = scalar_lea.sflag [#allocation9], %s1624_s24  ;;  %s1061_s13 = sshra.s32 %s583_s20, 4  ;;  %s1062_s13 = int_to_ptr.hbm [resolvable:$true] %s1061_s13 }
  0x35   : > { %377 = vst.msk [vmem:[%s1435_s15] sm:$0x3] %vm1404_vm1, %v1255_v23  ;;  %vm1462_vm3 = vcmp.eq.s32.totalorder %v445_v31, %v446_v32  ;;  %vm449_vm4 = vcmp.eq.s32.totalorder %v445_v31, %v447_v35  ;;  %s1063_s0 = scalar_lea.hbm %s1062_s13, 2  ;;  %p1068_p7 = scmp.lt.s32.totalorder %s1062_s13, %s1618_s3 }
  0x36   : > { %378 = vst.msk [vmem:[%s1441_s14] sm:$0x3] %vm1404_vm1, %v1255_v23  ;;  %p1064_p4 = scmp.ne.s32.totalorder %s1062_s13, %s1063_s0 }
  0x37   : > { %v383_v1 = vld.sshfl [vmem:[#allocation1] sm:$0xff pattern:$0x75316420]  ;;  %v384_v2 = vld.sshfl [vmem:[#allocation1 + $0x8] sm:$0xff pattern:$0x75316420] }
  0x38   : > { %v388_v3 = vsel %vm387_vm0, %v383_v1, -inf  ;;  %v395_v4 = vsel %vm387_vm0, %v384_v2, -inf  ;;  %p1065_p5 = pnand %p1064_p4, %p1347_p9 }
  0x39   : > { %v389_v5 = vrot.slane %v388_v3, 4  ;;  %v396_v6 = vrot.slane %v395_v4, 4 }
  0x3a   : > { %p1066_p6 = pneg %p1065_p5 }
  0x3b   : > { %v390_v7 = vmax.f32 %v388_v3, %v389_v5  ;;  %v397_v8 = vmax.f32 %v395_v4, %v396_v6  ;;  %v504_v40 = vld [vmem:[%s1428_s16] sm:$0x3] }
  0x3c   : > { %v505_v43 = vadd.f32 %v1468_v39, %v504_v40 }
  0x3d   : > { %v391_v9 = vrot.slane %v390_v7, 2  ;;  %v398_v10 = vrot.slane %v397_v8, 2 }
  0x3e   : > { %506 = vst.msk [vmem:[%s1428_s16] sm:$0x3] %vm1404_vm1, %v505_v43  ;;  %s1067_s16 = scalar_lea.hbm %s1618_s3, 4 }
  0x3f   : > { %v392_v11 = vmax.f32 %v390_v7, %v391_v9  ;;  %v399_v12 = vmax.f32 %v397_v8, %v398_v10  ;;  %p1069_p8 = scmp.lt.s32.totalorder %s1067_s16, %s1063_s0 }
  0x41   : > { %v393_v13 = vrot.slane %v392_v11, 1  ;;  %v400_v14 = vrot.slane %v399_v12, 1  ;;  %p1070_p10 = por %p1069_p8, %p1068_p7 }
  0x43   : > { %v401_v15 = vmax.f32 %v399_v12, %v400_v14  ;;  %v394_v16 = vmax.f32 %v392_v11, %v393_v13  ;;  %p1071_p13 = pnand %p1070_p10, %p1066_p6 }
  0x45   : > { %v404_v17 = vrot.slane %v401_v15, 4 }
  0x47   : > { %v405_v18 = vsel %vm387_vm0, %v394_v16, %v404_v17 }
  0x48   : > { %v407_v19 = vsub.f32 %v379_v0, %v405_v18 }
  0x4a   : > { %v408_v20 = vmul.f32 1.442695, %v407_v19 }
  0x4c   : > { %977 = vpow2.f32 %v408_v20 }
  0x52   : > { %v1414_v24 = vpop.eup %977 }
  0x53   : > { %411 = vst [vmem:[#allocation1] ss:$2 sm:$0xff] %v1414_v24 }
  0x5a   : > { %v412_v27 = vld.sshfl [vmem:[#allocation1] sm:$0xff pattern:$0x75316420]  ;;  %v413_v28 = vld.sshfl [vmem:[#allocation1 + $0x8] sm:$0xff pattern:$0x75316420] }
  0x5b   : > { %v416_v29 = vsel %vm387_vm0, %v412_v27, 0.0  ;;  %v423_v30 = vsel %vm387_vm0, %v413_v28, 0.0  ;;  %451 = vst [vmem:[#allocation1] ss:$2 sm:$0xff] %v407_v19 }
  0x5c   : > { %v417_v33 = vrot.slane %v416_v29, 4  ;;  %v424_v34 = vrot.slane %v423_v30, 4 }
  0x5e   : > { %v418_v36 = vadd.f32 %v417_v33, %v416_v29  ;;  %v425_v37 = vadd.f32 %v424_v34, %v423_v30 }
  0x60   : > { %v419_v41 = vrot.slane %v418_v36, 2  ;;  %v426_v42 = vrot.slane %v425_v37, 2 }
  0x62   : > { %v420_v44 = vadd.f32 %v419_v41, %v418_v36  ;;  %v427_v45 = vadd.f32 %v426_v42, %v425_v37  ;;  %v452_v46 = vld.sshfl [vmem:[#allocation1] sm:$0xff pattern:$0x75316420]  ;;  %v453_v47 = vld.sshfl [vmem:[#allocation1 + $0x8] sm:$0xff pattern:$0x75316420] }
  0x63   : > { %v456_v48 = vsel %vm1462_vm3, %v452_v46, 0.0  ;;  %v457_v49 = vsel %vm449_vm4, %v453_v47, 0.0 }
  0x64   : > { %v421_v50 = vrot.slane %v420_v44, 1  ;;  %v428_v51 = vrot.slane %v427_v45, 1  ;;  %v458_v52 = vsel %vm387_vm0, %v456_v48, 0.0  ;;  %v465_v53 = vsel %vm387_vm0, %v457_v49, 0.0 }
  0x65   : > { %1074 = shalt.err (!%p1071_p13)
}
  0x66   : > { %893 = dma.vmem_to_hbm [thread:$0]  (%p1347_p9), %s581_s28, 32, %s583_s20, %s1482_s8   ;;  %v459_v54 = vrot.slane %v458_v52, 4  ;;  %v466_v55 = vrot.slane %v465_v53, 4  ;;  %v422_v56 = vadd.f32 %v421_v50, %v420_v44  ;;  %v429_v57 = vadd.f32 %v428_v51, %v427_v45  ;;  %v530_v63 = vld [vmem:[%s1441_s14] sm:$0x3] }
  0x67   : > { %v481_v60 = vcvt.s32.f32 %v1418_v25  ;;  %v1256_v14 = vmov 286326784   ;;  %v487_v19 = vperm.slane %v1468_v39, 1  ;;  %v486_v25 = vperm.slane %v1468_v39, 0  ;;  %s1641_s2 = sld [smem:[#allocation23_spill]]  ;;  %v482_v30 = vld [vmem:[%s1409_s9] sm:$0x3] }
  0x68   : > { %v460_v58 = vadd.f32 %v459_v54, %v458_v52  ;;  %v467_v59 = vadd.f32 %v466_v55, %v465_v53  ;;  %979 = vrcp.f32 %v422_v56  ;;  %v510_v15 = vunpack.c.l.s4 %v1256_v14  ;;  %s566_s0 = sshll.u32 %s1409_s9, 4  ;;  %s534_s18 = scalar_lea.sflag [#allocation4], %s1384_s11  ;;  %s567_s0 = int_to_ptr.vmem [resolvable:$true] %s566_s0 }
  0x69   : > { %981 = vrcp.f32 %v429_v57  ;;  %v531_v0 = vadd.f32 %v530_v63, %v481_v60  ;;  %vm495_vm5 = vcmask 1040384  }
  0x6a   : > { %v461_v61 = vrot.slane %v460_v58, 2  ;;  %v468_v62 = vrot.slane %v467_v59, 2  ;;  %983 = vlog2.f32 %v422_v56  ;;  %v511_v26 = vunpack.c.0.s8 %v510_v15 }
  0x6b   : > { %985 = vlog2.f32 %v429_v57  ;;  %532 = vst.msk [vmem:[%s1441_s14] sm:$0x3] %vm1404_vm1, %v531_v0 }
  0x6c   : > { %v462_v1 = vadd.f32 %v461_v61, %v460_v58  ;;  %v469_v2 = vadd.f32 %v468_v62, %v467_v59  ;;  %v512_v35 = vperm.slane %v481_v60, %v511_v26 }
  0x6d   : > { %s564_s13 = scalar_lea.hbm %s1641_s2, %s1450_s17  ;;  %s1095_s20 = scalar_lea.hbm %s1641_s2, 4 }
  0x6e   : > { %v463_v3 = vrot.slane %v462_v1, 1  ;;  %v470_v4 = vrot.slane %v469_v2, 1  ;;  %v980_v5 = vpop.eup %979  ;;  %s568_s29 = sshll.u32 %s564_s13, 4  ;;  %s569_s29 = int_to_ptr.hbm [resolvable:$true] %s568_s29 }
  0x6f   : > { %v982_v6 = vpop.eup %981  ;;  %v432_v7 = vmul.f32 %v980_v5, %v422_v56  ;;  %s1089_s16 = sshra.s32 %s569_s29, 4  ;;  %s1090_s16 = int_to_ptr.hbm [resolvable:$true] %s1089_s16 }
  0x70   : > { %v984_v8 = vpop.eup %983  ;;  %v433_v9 = vmul.f32 %v982_v6, %v429_v57  ;;  %v464_v10 = vadd.f32 %v463_v3, %v462_v1  ;;  %v471_v11 = vadd.f32 %v470_v4, %v469_v2  ;;  %s1091_s19 = scalar_lea.hbm %s1090_s16, 2  ;;  %p1096_p3 = scmp.lt.s32.totalorder %s1090_s16, %s1641_s2 }
  0x71   : > { %v986_v12 = vpop.eup %985  ;;  %v439_v13 = vmul.f32 0.6931472, %v984_v8  ;;  %v434_v16 = vsub.f32 2.0, %v432_v7  ;;  %p1092_p0 = scmp.ne.s32.totalorder %s1090_s16, %s1091_s19  ;;  %p1097_p4 = scmp.lt.s32.totalorder %s1095_s20, %s1091_s19 }
  0x72   : > { %v435_v17 = vsub.f32 2.0, %v433_v9  ;;  %v441_v18 = vmul.f32 0.6931472, %v986_v12 }
  0x73   : > { %v483_v21 = vsub.f32 %v439_v13, %v464_v10  ;;  %v436_v27 = vmul.f32 %v980_v5, %v434_v16  ;;  %p1093_p1 = pnand %p1092_p0, %p1347_p9  ;;  %p1098_p5 = por %p1097_p4, %p1096_p3 }
  0x74   : > { %v437_v20 = vmul.f32 %v982_v6, %v435_v17  ;;  %v484_v23 = vsub.f32 %v441_v18, %v471_v11 }
  0x75   : > { %v490_v31 = vmul.f32 %v486_v25, %v483_v21  ;;  %p1094_p2 = pneg %p1093_p1 }
  0x76   : > { %v476_v28 = vrot.slane %v437_v20, 4  ;;  %v491_v29 = vmul.f32 %v487_v19, %v484_v23 }
  0x77   : > { %p1099_p6 = pnand %p1098_p5, %p1094_p2 }
  0x78   : > { %v494_v32 = vrot.slane %v491_v29, 7  ;;  %v477_v33 = vsel %vm387_vm0, %v436_v27, %v476_v28 }
  0x79   : > { %v478_v34 = vrot.slane %v477_v33, 7 }
  0x7a   : > { %v496_v36 = vsel %vm495_vm5, %v490_v31, %v494_v32 }
  0x7b   : > { %v498_v37 = vadd.f32 %v496_v36, %v482_v30  ;;  %v480_v38 = vmul.f32 %v1414_v24, %v478_v34 }
  0x7d   : > { %503 = vst.msk [vmem:[%s1409_s9] sm:$0x3] %vm1404_vm1, %v498_v37  ;;  %v514_v39 = vmul.f32 %v512_v35, %v480_v38 }
  0x7e   : > { %1102 = shalt.err (!%p1099_p6)
}
  0x7f   : > { %892 = dma.vmem_to_hbm [thread:$0]  (%p1347_p9), %s567_s0, 32, %s569_s29, %s534_s18   ;;  %516 = vst [vmem:[#allocation1] sm:$0xff] %v514_v39  ;;  %v507_v24 = vld [vmem:[%s1421_s30] sm:$0x3] }
  0x80   : > { %s592_s7 = scalar_lea.hbm %s1619_s4, %s1450_s17  ;;  %s594_s24 = sshll.u32 %s1421_s30, 4  ;;  %s595_s24 = int_to_ptr.vmem [resolvable:$true] %s594_s24 }
  0x81   : > { %s596_s16 = sshll.u32 %s592_s7, 4  ;;  %s606_s0 = scalar_lea.hbm %s1620_s5, %s1450_s17  ;;  %s597_s16 = int_to_ptr.hbm [resolvable:$true] %s596_s16 }
  0x82   : > { %s620_s20 = scalar_lea.hbm %s1621_s6, %s1450_s17  ;;  %s1117_s13 = sshra.s32 %s597_s16, 4  ;;  %s1118_s13 = int_to_ptr.hbm [resolvable:$true] %s1117_s13 }
  0x83   : > { %s1119_s11 = scalar_lea.hbm %s1118_s13, 2  ;;  %s1123_s1 = scalar_lea.hbm %s1619_s4, 4 }
  0x84   : > { %p1120_p7 = scmp.ne.s32.totalorder %s1118_s13, %s1119_s11  ;;  %p1124_p13 = scmp.lt.s32.totalorder %s1118_s13, %s1619_s4 }
  0x85   : > { %p1125_p0 = scmp.lt.s32.totalorder %s1123_s1, %s1119_s11 }
  0x86   : > { %v518_v40 = vld [vmem:[#allocation1 + $0x1] ss:$4 sm:$0xff]  ;;  %p1121_p8 = pnand %p1120_p7, %p1347_p9 }
  0x87   : > { %v520_v41 = vadd.f32 %v518_v40, %v507_v24  ;;  %524 = vst [vmem:[#allocation1] sm:$0xff] %v480_v38  ;;  %p1126_p1 = por %p1125_p0, %p1124_p13 }
  0x88   : > { %p1122_p10 = pneg %p1121_p8 }
  0x89   : > { %521 = vst.msk [vmem:[%s1421_s30] sm:$0x3] %vm1404_vm1, %v520_v41 }
  0x8a   : > { %p1127_p2 = pnand %p1126_p1, %p1122_p10 }
  0x8c   : > { %1130 = shalt.err (!%p1127_p2)
}
  0x8d   : > { %894 = dma.vmem_to_hbm [thread:$0]  (%p1347_p9), %s595_s24, 32, %s597_s16, %s1482_s8   ;;  %v522_v42 = vld [vmem:[%s1435_s15] sm:$0x3] }
  0x8e   : > { %s608_s17 = sshll.u32 %s1435_s15, 4  ;;  %s610_s19 = sshll.u32 %s606_s0, 4  ;;  %v526_v43 = vld [vmem:[#allocation1 + $0x1] ss:$4 sm:$0xff]  ;;  %s609_s17 = int_to_ptr.vmem [resolvable:$true] %s608_s17  ;;  %s611_s19 = int_to_ptr.hbm [resolvable:$true] %s610_s19 }
  0x8f   : > { %s622_s28 = sshll.u32 %s1441_s14, 4  ;;  %s1555_s2 = sshll.u32 %s620_s20, 4  ;;  %v528_v44 = vadd.f32 %v526_v43, %v522_v42  ;;  %s1557_s28 = int_to_ptr.vmem [resolvable:$true] %s622_s28  ;;  %s625_s2 = int_to_ptr.hbm [resolvable:$true] %s1555_s2 }
  0x90   : > { %s1642_s1 = sand.u32 1, %s1323_s27   ;;  %s1145_s24 = sshra.s32 %s611_s19, 4  ;;  %s1146_s24 = int_to_ptr.hbm [resolvable:$true] %s1145_s24 }
  0x91   : > { %529 = vst.msk [vmem:[%s1435_s15] sm:$0x3] %vm1404_vm1, %v528_v44  ;;  %s549_s8 = scalar_lea.sflag [#allocation12], %s1642_s1  ;;  %s1147_s16 = scalar_lea.hbm %s1146_s24, 2 }
  0x92   : > { %p1148_p3 = scmp.ne.s32.totalorder %s1146_s24, %s1147_s16  ;;  %s1151_s29 = scalar_lea.hbm %s1620_s5, 4 }
  0x93   : > { %p1152_p6 = scmp.lt.s32.totalorder %s1146_s24, %s1620_s5  ;;  %p1153_p7 = scmp.lt.s32.totalorder %s1151_s29, %s1147_s16 }
  0x94   : > { %p1149_p4 = pnand %p1148_p3, %p1347_p9 }
  0x95   : > { %p1154_p8 = por %p1153_p7, %p1152_p6 }
  0x96   : > { %p1150_p5 = pneg %p1149_p4 }
  0x98   : > { %p1155_p10 = pnand %p1154_p8, %p1150_p5 }
  0x9a   : > { %1158 = shalt.err (!%p1155_p10)
}
  0x9b   : > { %895 = dma.vmem_to_hbm [thread:$0]  (%p1347_p9), %s609_s17, 32, %s611_s19, %s549_s8  }
  0x9c   : > { %s1173_s27 = sshra.s32 %s625_s2, 4  ;;  %s1179_s9 = scalar_lea.hbm %s1621_s6, 4  ;;  %s1174_s27 = int_to_ptr.hbm [resolvable:$true] %s1173_s27 }
  0x9d   : > { %s1175_s15 = scalar_lea.hbm %s1174_s27, 2  ;;  %p1180_p2 = scmp.lt.s32.totalorder %s1174_s27, %s1621_s6 }
  0x9e   : > { %p1176_p13 = scmp.ne.s32.totalorder %s1174_s27, %s1175_s15  ;;  %p1181_p3 = scmp.lt.s32.totalorder %s1179_s9, %s1175_s15 }
  0xa0   : > { %p1177_p0 = pnand %p1176_p13, %p1347_p9  ;;  %p1182_p4 = por %p1181_p3, %p1180_p2 }
  0xa2   : > { %p1178_p1 = pneg %p1177_p0 }
  0xa4   : > { %p1183_p5 = pnand %p1182_p4, %p1178_p1 }
  0xa6   : > { %1186 = shalt.err (!%p1183_p5)
}
  0xa7   : > { %896 = dma.vmem_to_hbm [thread:$0]  (%p1347_p9), %s1557_s28, 32, %s625_s2, %s549_s8  }
  0xa8 PF: > { %s636_s17 = sand.u32 1, %s1233_s21   ;;  %p910_p6 = pnand %p860_p12, %p1356_p11 }
  0xa9   : > { %s637_s19 = scalar_lea.sflag [#allocation4], %s636_s17 }
  0xaa   : > { %p911_p7 = pneg %p910_p6 }
  0xac   : > { %1220 = dma.done.wait (%p911_p7), %s637_s19, 32  }
  0xad   : > { %1222 = vsyncadd (%p911_p7), %s637_s19, 4294967264  ;;  %s1643_s1 = sadd.s32 4294967294, %s1253_s26  }
  0xae   : > { %s646_s24 = sand.u32 1, %s1643_s1  }
  0xaf   : > { %s647_s10 = scalar_lea.sflag [#allocation9], %s646_s24 }
  0xb0   : > { %1224 = dma.done.wait (%p911_p7), %s647_s10, 64  }
  0xb1   : > { %1226 = vsyncadd (%p911_p7), %s647_s10, 4294967232  ;;  %s667_s16 = scalar_lea.sflag [#allocation12], %s646_s24 }
  0xb2   : > { %1228 = dma.done.wait (%p911_p7), %s667_s16, 64  }
  0xb3   : > { %1230 = vsyncadd (%p911_p7), %s667_s16, 4294967232  ;;  %s32_s26 = sadd.s32 1, %s1253_s26   ;;  %s1644_s12 = sld [smem:[#allocation20_spill]] }
  0xb4   : > { %p29_p9 = scmp.ge.s32.totalorder %s32_s26, 4   ;;  %s1645_s28 = sld [smem:[#allocation19_spill]] }
  0xb5   : > { %s1646_s21 = smov %s1237_s22  ;;  %s1647_s22 = smov %s1241_s23 }
  0xb6   : > { %s1649_s24 = smov %s1249_s25  ;;  %31 = sbr.rel (!%p29_p9) target bundleno = 16 (0x10), region = 156 }
  0xb9   : > { %s1648_s23 = smov %s1644_s12 }
  0xba   : > { %s1650_s25 = smov %s1645_s28 }
  0xbb   :  { %683 = vsyncpa [#allocation3], 1 }
  0xbc   :  { %685 = vsyncpa [#allocation3 + $0x1], 1 }
  0xbd   :  { %686 = vsyncpa [#allocation6], 1 }
  0xbe   :  { %688 = vsyncpa [#allocation6 + $0x1], 1 }
  0xbf   :  { %689 = vsyncpa [#allocation4], 1 }
  0xc0   :  { %691 = vsyncpa [#allocation4 + $0x1], 1 }
  0xc1   :  { %692 = vsyncpa [#allocation9], 1 }
  0xc2   :  { %694 = vsyncpa [#allocation9 + $0x1], 1 }
  0xc3   :  { %695 = vsyncpa [#allocation12], 1 }
  0xc4   :  { %697 = vsyncpa [#allocation12 + $0x1], 1 }

</bundles_post_ra>
